<compile_context>
chip_gen: v7x
topology: tpu7x:2x2x1
jax: 0.10.0
libtpu: 0.0.40
codegen_flags: <defaults>
</compile_context>

<pallas_src>
import math
import jax
import jax.numpy as jnp
from jax.experimental import pallas as pl
from jax.experimental.pallas import tpu as pltpu

# ---------------- model hyper-parameters (small, synthetic) -----------------
B = 2              # batch
C_IN = 4           # input channels
H = W = 16         # spatial
C_OUT = 8          # conv output channels
FEATURES = 32      # embedding dim
NUM_CLASSES = 16   # margin classes
KSIZE = 3
K = C_IN * KSIZE * KSIZE   # im2col contraction dim = 36
KP1 = K + 1                # + ones row for the folded conv bias = 37
HW = H * W                 # 256

# ArcFace constants
ARC_S = 30.0
ARC_M = 0.50
COS_M = math.cos(ARC_M)
SIN_M = math.sin(ARC_M)
TH = math.cos(math.pi - ARC_M)
MM = math.sin(math.pi - ARC_M) * ARC_M

# ---------------- packed parameter slab / packed output layout --------------
# bf16 slab, param starts 16-row aligned (bf16 sublane tile):
ROW_WC = 0                     # rows 0:8   cols 0:37  -> conv weight | bias col
ROW_WFC = 16                   # rows 16:48 cols 0:8   -> FC weight^T, col 8 -> FC bias
ROW_WM = 48                    # rows 48:64 cols 0:32  -> margin weight (C, F)
ROW_OH = 64                    # rows 64:80 cols 0:B   -> one-hot target^T (C, B)
SLAB_ROWS, SLAB_COLS = 80, 64

PACK_ROWS = 2 * NUM_CLASSES + FEATURES   # 64: [output^T | cosine^T | feature^T]

_COST = pl.CostEstimate(
    flops=(2 * C_OUT * KP1 * (B * HW)          # conv matmul
           + 2 * FEATURES * C_OUT * B          # FC matmul
           + 2 * NUM_CLASSES * FEATURES * B),  # cosine matmul
    transcendentals=B + NUM_CLASSES + NUM_CLASSES * B,   # rsqrt + rsqrt + sqrt
    bytes_accessed=(KP1 * B * HW * 2 + SLAB_ROWS * SLAB_COLS * 2
                    + PACK_ROWS * B * 4),
)


# ------------------------------ fused kernel ---------------------------------
def fused_kernel(patch_ref, slab_ref, out_ref):
    # ---------------- encoder: conv as one lane-dense matmul -----------------
    # (C_OUT, K+1) @ (K+1, B*HW) = (8, 512); conv bias folded via the ones row.
    wc_aug = slab_ref[ROW_WC:ROW_WC + C_OUT, 0:KP1]                  # (8, 37) bf16
    h = jnp.dot(wc_aug, patch_ref[...], preferred_element_type=jnp.float32)
    h = jnp.maximum(h, 0.0)                                          # (8, 512) f32

    # ---------------- global average pool: tile-aligned lane-slice reduces ---
    # 256-lane slices (multiples of 128) -> XLU reduce; placed into lane b of
    # a tiny (C_OUT, B) tile. Static unrolled loop is fine at toy B.
    lane_id = jax.lax.broadcasted_iota(jnp.int32, (C_OUT, B), 1)
    pooled_t = jnp.zeros((C_OUT, B), jnp.float32)
    for b in range(B):
        pb = jnp.sum(h[:, b * HW:(b + 1) * HW], axis=1, keepdims=True)   # (8, 1)
        pooled_t = jnp.where(lane_id == b, pb, pooled_t)
    pooled_t = pooled_t * jnp.float32(1.0 / HW)                      # (8, B)

    # ---------------- FC: feat^T = W_fc^T @ pooled + b_fc --------------------
    wfc_t = slab_ref[ROW_WFC:ROW_WFC + FEATURES, 0:C_OUT]            # (32, 8) bf16
    bfc_col = slab_ref[ROW_WFC:ROW_WFC + FEATURES,
                       C_OUT:C_OUT + 1].astype(jnp.float32)          # (32, 1)
    feat_t = jnp.dot(wfc_t, pooled_t.astype(jnp.bfloat16),
                     preferred_element_type=jnp.float32) + bfc_col   # (32, B) f32

    # ---------------- ArcFace margin head (normalization / trig in f32) ------
    wm = slab_ref[ROW_WM:ROW_WM + NUM_CLASSES,
                  0:FEATURES].astype(jnp.float32)                    # (16, 32)
    f_inv = jax.lax.rsqrt(jnp.sum(feat_t * feat_t, axis=0, keepdims=True)
                          + 1e-12)                                   # (1, B)
    w_inv = jax.lax.rsqrt(jnp.sum(wm * wm, axis=1, keepdims=True) + 1e-12)  # (16, 1)
    fn_t = (feat_t * f_inv).astype(jnp.bfloat16)                     # (32, B)
    wn = (wm * w_inv).astype(jnp.bfloat16)                           # (16, 32)
    cos_t = jnp.dot(wn, fn_t, preferred_element_type=jnp.float32)    # (16, B)
    cos_t = jnp.clip(cos_t, -1.0, 1.0)
    sin_t = jnp.sqrt(jnp.maximum(1.0 - cos_t * cos_t, 0.0))
    phi_t = cos_t * COS_M - sin_t * SIN_M
    phi_t = jnp.where(cos_t > TH, phi_t, cos_t - MM)

    one_hot_t = slab_ref[ROW_OH:ROW_OH + NUM_CLASSES, 0:B] > 0.5     # (16, B) bool
    out_t = jnp.where(one_hot_t, phi_t, cos_t) * ARC_S               # (16, B)

    # ---------------- single packed output (1 output DMA) --------------------
    out_ref[0:NUM_CLASSES, :] = out_t
    out_ref[NUM_CLASSES:2 * NUM_CLASSES, :] = cos_t
    out_ref[2 * NUM_CLASSES:PACK_ROWS, :] = feat_t


# ------------------------------- JAX wrappers --------------------------------
def fused_forward(patches_aug, slab):
    vmem = pl.BlockSpec(memory_space=pltpu.MemorySpace.VMEM)
    return pl.pallas_call(
        fused_kernel,
        out_shape=jax.ShapeDtypeStruct((PACK_ROWS, B), jnp.float32),
        in_specs=[vmem, vmem],
        out_specs=vmem,
        cost_estimate=_COST,
    )(patches_aug, slab)


def make_patches(x):
    """x: (B, C, H, W) NCHW -> (K, B*H*W) f32 im2col in lane-dense layout.

    Column index = b*HW + h*W + w. Single fused XLA op (no pad/slice chain).
    NOTE: the K-row ordering matches this script's synthetic weight layout; a
    real PyTorch conv weight would need its (c, kh, kw) ordering verified.
    """
    p = jax.lax.conv_general_dilated_patches(
        x, filter_shape=(KSIZE, KSIZE), window_strides=(1, 1),
        padding=((1, 1), (1, 1)),
        dimension_numbers=('NCHW', 'OIHW', 'NCHW'))                  # (B, K, H, W)
    return p.transpose(1, 0, 2, 3).reshape(K, B * HW)


def prep_inputs(x, target, params):
    """Build the two kernel operands: bf16 patch matrix and bf16 param slab."""
    wc, bc, wfc, bfc, wm = params
    # patches + ones row (folded conv bias); bf16 cast fuses with the
    # transpose/reshape under jit.
    patches = make_patches(x)
    patches_aug = jnp.concatenate(
        [patches, jnp.ones((1, B * HW), patches.dtype)], axis=0
    ).astype(jnp.bfloat16)                                           # (37, 512)

    slab = jnp.zeros((SLAB_ROWS, SLAB_COLS), jnp.float32)
    wc_aug = jnp.concatenate([wc, bc[:, None]], axis=1)              # (8, 37)
    slab = slab.at[ROW_WC:ROW_WC + C_OUT, 0:KP1].set(wc_aug)
    slab = slab.at[ROW_WFC:ROW_WFC + FEATURES, 0:C_OUT].set(wfc.T)   # (32, 8)
    slab = slab.at[ROW_WFC:ROW_WFC + FEATURES, C_OUT:C_OUT + 1].set(bfc[:, None])
    slab = slab.at[ROW_WM:ROW_WM + NUM_CLASSES, 0:FEATURES].set(wm)
    one_hot_t = (jnp.arange(NUM_CLASSES)[:, None]
                 == target[None, :]).astype(jnp.float32)             # (C, B)
    slab = slab.at[ROW_OH:ROW_OH + NUM_CLASSES, 0:B].set(one_hot_t)
    return patches_aug, slab.astype(jnp.bfloat16)


@jax.jit
def base_model_forward(x, target, params):
    patches_aug, slab = prep_inputs(x, target.astype(jnp.int32), params)
    packed = fused_forward(patches_aug, slab)                        # (64, B)
    packed = packed.T                                                # (B, 64) cheap XLA op
    output = packed[:, 0:NUM_CLASSES]
    cosine = packed[:, NUM_CLASSES:2 * NUM_CLASSES]
    feature = packed[:, 2 * NUM_CLASSES:2 * NUM_CLASSES + FEATURES]
    return output, cosine, feature


def reference_forward(x, target, params):
    """Plain-JAX reference mirroring the kernel's bf16 MXU-operand rounding."""
    wc, bc, wfc, bfc, wm = params
    q = lambda a: a.astype(jnp.bfloat16).astype(jnp.float32)
    patches = make_patches(x)                                        # (K, B*HW) f32
    h = jnp.maximum(q(wc) @ q(patches) + q(bc)[:, None], 0.0)        # (C_OUT, B*HW)
    pooled = h.reshape(C_OUT, B, HW).mean(axis=2)                    # (C_OUT, B)
    feat = q(pooled).T @ q(wfc) + q(bfc)[None, :]                    # (B, F)
    w = q(wm)
    fn = feat * jax.lax.rsqrt(jnp.sum(feat * feat, axis=1, keepdims=True) + 1e-12)
    wn = w * jax.lax.rsqrt(jnp.sum(w * w, axis=1, keepdims=True) + 1e-12)
    cosine = jnp.clip(q(fn) @ q(wn).T, -1.0, 1.0)
    sine = jnp.sqrt(jnp.maximum(1.0 - cosine * cosine, 0.0))
    phi = cosine * COS_M - sine * SIN_M
    phi = jnp.where(cosine > TH, phi, cosine - MM)
    one_hot = target[:, None] == jnp.arange(NUM_CLASSES)[None, :]
    output = jnp.where(one_hot, phi, cosine) * ARC_S
    return output, cosine, feat


# ----------------------------------- main ------------------------------------
if __name__ == "__main__":
    key = jax.random.PRNGKey(0)
    kx, kt, k1, k2, k3 = jax.random.split(key, 5)

    # example inputs (NCHW, like PyTorch)
    x = jax.random.normal(kx, (B, C_IN, H, W), dtype=jnp.float32)
    target = jax.random.randint(kt, (B,), 0, NUM_CLASSES, dtype=jnp.int32)

    # deterministic synthetic parameters
    wc = (jax.random.normal(k1, (C_OUT, C_IN, KSIZE, KSIZE), jnp.float32) * 0.1
          ).reshape(C_OUT, K)                                        # (C_OUT, K)
    bc = jnp.zeros((C_OUT,), jnp.float32)
    wfc = jax.random.normal(k2, (C_OUT, FEATURES), jnp.float32) * 0.1
    bfc = jnp.zeros((FEATURES,), jnp.float32)
    wm = jax.random.normal(k3, (NUM_CLASSES, FEATURES), jnp.float32) * 0.1
    params = (wc, bc, wfc, bfc, wm)

    output, cosine, feature = base_model_forward(x, target, params)
    jax.block_until_ready((output, cosine, feature))

    assert output.shape == (B, NUM_CLASSES)
    assert cosine.shape == (B, NUM_CLASSES)
    assert feature.shape == (B, FEATURES)

    ref_out, ref_cos, ref_feat = reference_forward(x, target, params)
    # bf16 MXU-operand rounding -> intentional ~1e-2 drift budget vs pure f32.
    assert jnp.allclose(output, ref_out, rtol=2e-2, atol=2e-2)
    assert jnp.allclose(cosine, ref_cos, rtol=2e-2, atol=2e-2)
    assert jnp.allclose(feature, ref_feat, rtol=2e-2, atol=2e-2)

    print("KERNEL_OK")
</pallas_src>

<mosaic_0001>
module attributes {stable_mosaic.version = 11 : i64} {
  func.func @fused_kernel(%arg0: memref<37x512xbf16, #tpu.memory_space<vmem>>, %arg1: memref<80x64xbf16, #tpu.memory_space<vmem>>, %arg2: memref<64x2xf32, #tpu.memory_space<vmem>>) attributes {dimension_semantics = [], scalar_prefetch = 0 : i64, scratch_operands = 0 : i64, tpu.core_type = #tpu.core_type<tc>} {
    %c0 = arith.constant 0 : index
    %c0_0 = arith.constant 0 : index
    %0 = vector.load %arg1[%c0, %c0_0] : memref<80x64xbf16, #tpu.memory_space<vmem>>, vector<8x37xbf16>
    %c0_1 = arith.constant 0 : index
    %c0_2 = arith.constant 0 : index
    %1 = vector.load %arg0[%c0_1, %c0_2] : memref<37x512xbf16, #tpu.memory_space<vmem>>, vector<37x512xbf16>
    %cst = arith.constant dense<0.000000e+00> : vector<8x512xf32>
    %2 = tpu.matmul %0, %1, %cst {dimension_numbers = #tpu.dot_dimension_numbers<[1], [0], [0], [1], [0, 0, 1, 1], [], []>} : vector<8x37xbf16>, vector<37x512xbf16>, vector<8x512xf32> -> vector<8x512xf32>
    %cst_3 = arith.constant 0.000000e+00 : f32
    %3 = vector.broadcast %cst_3 : f32 to vector<8x512xf32>
    %4 = arith.maximumf %2, %3 : vector<8x512xf32>
    %5 = tpu.iota {dimensions = array<i32: 1>} : vector<8x2xi32>
    %cst_4 = arith.constant 0.000000e+00 : f32
    %6 = vector.broadcast %cst_4 : f32 to vector<8x2xf32>
    %7 = vector.extract_strided_slice %4 {offsets = [0, 0], sizes = [8, 256], strides = [1, 1]} : vector<8x512xf32> to vector<8x256xf32>
    %cst_5 = arith.constant dense<0.000000e+00> : vector<8xf32>
    %8 = vector.multi_reduction <add>, %7, %cst_5 [1] : vector<8x256xf32> to vector<8xf32>
    %9 = vector.shape_cast %8 : vector<8xf32> to vector<8x1xf32>
    %c0_i32 = arith.constant 0 : i32
    %10 = vector.broadcast %c0_i32 : i32 to vector<8x2xi32>
    %11 = arith.cmpi eq, %5, %10 : vector<8x2xi32>
    %12 = vector.shape_cast %9 : vector<8x1xf32> to vector<8x1xf32>
    %13 = vector.broadcast %12 : vector<8x1xf32> to vector<8x2xf32>
    %14 = arith.select %11, %13, %6 : vector<8x2xi1>, vector<8x2xf32>
    %15 = vector.extract_strided_slice %4 {offsets = [0, 256], sizes = [8, 256], strides = [1, 1]} : vector<8x512xf32> to vector<8x256xf32>
    %cst_6 = arith.constant dense<0.000000e+00> : vector<8xf32>
    %16 = vector.multi_reduction <add>, %15, %cst_6 [1] : vector<8x256xf32> to vector<8xf32>
    %17 = vector.shape_cast %16 : vector<8xf32> to vector<8x1xf32>
    %c1_i32 = arith.constant 1 : i32
    %18 = vector.broadcast %c1_i32 : i32 to vector<8x2xi32>
    %19 = arith.cmpi eq, %5, %18 : vector<8x2xi32>
    %20 = vector.shape_cast %17 : vector<8x1xf32> to vector<8x1xf32>
    %21 = vector.broadcast %20 : vector<8x1xf32> to vector<8x2xf32>
    %22 = arith.select %19, %21, %14 : vector<8x2xi1>, vector<8x2xf32>
    %cst_7 = arith.constant 3.906250e-03 : f32
    %23 = vector.broadcast %cst_7 : f32 to vector<8x2xf32>
    %24 = arith.mulf %22, %23 : vector<8x2xf32>
    %c16 = arith.constant 16 : index
    %c0_8 = arith.constant 0 : index
    %25 = vector.load %arg1[%c16, %c0_8] : memref<80x64xbf16, #tpu.memory_space<vmem>>, vector<32x8xbf16>
    %c16_9 = arith.constant 16 : index
    %c8 = arith.constant 8 : index
    %26 = vector.load %arg1[%c16_9, %c8] : memref<80x64xbf16, #tpu.memory_space<vmem>>, vector<32x1xbf16>
    %27 = arith.extf %26 : vector<32x1xbf16> to vector<32x1xf32>
    %28 = arith.truncf %24 : vector<8x2xf32> to vector<8x2xbf16>
    %cst_10 = arith.constant dense<0.000000e+00> : vector<32x2xf32>
    %29 = tpu.matmul %25, %28, %cst_10 {dimension_numbers = #tpu.dot_dimension_numbers<[1], [0], [0], [1], [0, 0, 1, 1], [], []>} : vector<32x8xbf16>, vector<8x2xbf16>, vector<32x2xf32> -> vector<32x2xf32>
    %30 = vector.broadcast %27 : vector<32x1xf32> to vector<32x2xf32>
    %31 = arith.addf %29, %30 : vector<32x2xf32>
    %c48 = arith.constant 48 : index
    %c0_11 = arith.constant 0 : index
    %32 = vector.load %arg1[%c48, %c0_11] : memref<80x64xbf16, #tpu.memory_space<vmem>>, vector<16x32xbf16>
    %33 = arith.extf %32 : vector<16x32xbf16> to vector<16x32xf32>
    %34 = arith.mulf %31, %31 : vector<32x2xf32>
    %cst_12 = arith.constant dense<0.000000e+00> : vector<2xf32>
    %35 = vector.multi_reduction <add>, %34, %cst_12 [0] : vector<32x2xf32> to vector<2xf32>
    %36 = vector.shape_cast %35 : vector<2xf32> to vector<1x2xf32>
    %cst_13 = arith.constant 9.99999996E-13 : f32
    %37 = vector.broadcast %cst_13 : f32 to vector<1x2xf32>
    %38 = arith.addf %36, %37 : vector<1x2xf32>
    %39 = math.rsqrt %38 : vector<1x2xf32>
    %40 = arith.mulf %33, %33 : vector<16x32xf32>
    %cst_14 = arith.constant dense<0.000000e+00> : vector<16xf32>
    %41 = vector.multi_reduction <add>, %40, %cst_14 [1] : vector<16x32xf32> to vector<16xf32>
    %42 = vector.shape_cast %41 : vector<16xf32> to vector<16x1xf32>
    %cst_15 = arith.constant 9.99999996E-13 : f32
    %43 = vector.broadcast %cst_15 : f32 to vector<16x1xf32>
    %44 = arith.addf %42, %43 : vector<16x1xf32>
    %45 = math.rsqrt %44 : vector<16x1xf32>
    %46 = vector.broadcast %39 : vector<1x2xf32> to vector<32x2xf32>
    %47 = arith.mulf %31, %46 : vector<32x2xf32>
    %48 = arith.truncf %47 : vector<32x2xf32> to vector<32x2xbf16>
    %49 = vector.broadcast %45 : vector<16x1xf32> to vector<16x32xf32>
    %50 = arith.mulf %33, %49 : vector<16x32xf32>
    %51 = arith.truncf %50 : vector<16x32xf32> to vector<16x32xbf16>
    %cst_16 = arith.constant dense<0.000000e+00> : vector<16x2xf32>
    %52 = tpu.matmul %51, %48, %cst_16 {dimension_numbers = #tpu.dot_dimension_numbers<[1], [0], [0], [1], [0, 0, 1, 1], [], []>} : vector<16x32xbf16>, vector<32x2xbf16>, vector<16x2xf32> -> vector<16x2xf32>
    %cst_17 = arith.constant -1.000000e+00 : f32
    %cst_18 = arith.constant 1.000000e+00 : f32
    %53 = vector.broadcast %cst_17 : f32 to vector<16x2xf32>
    %54 = arith.maximumf %53, %52 : vector<16x2xf32>
    %55 = vector.broadcast %cst_18 : f32 to vector<16x2xf32>
    %56 = arith.minimumf %55, %54 : vector<16x2xf32>
    %57 = arith.mulf %56, %56 : vector<16x2xf32>
    %cst_19 = arith.constant 1.000000e+00 : f32
    %58 = vector.broadcast %cst_19 : f32 to vector<16x2xf32>
    %59 = arith.subf %58, %57 : vector<16x2xf32>
    %cst_20 = arith.constant 0.000000e+00 : f32
    %60 = vector.broadcast %cst_20 : f32 to vector<16x2xf32>
    %61 = arith.maximumf %59, %60 : vector<16x2xf32>
    %62 = math.sqrt %61 : vector<16x2xf32>
    %cst_21 = arith.constant 0.87758255 : f32
    %63 = vector.broadcast %cst_21 : f32 to vector<16x2xf32>
    %64 = arith.mulf %56, %63 : vector<16x2xf32>
    %cst_22 = arith.constant 0.47942555 : f32
    %65 = vector.broadcast %cst_22 : f32 to vector<16x2xf32>
    %66 = arith.mulf %62, %65 : vector<16x2xf32>
    %67 = arith.subf %64, %66 : vector<16x2xf32>
    %cst_23 = arith.constant -0.87758255 : f32
    %68 = vector.broadcast %cst_23 : f32 to vector<16x2xf32>
    %69 = arith.cmpf ogt, %56, %68 : vector<16x2xf32>
    %cst_24 = arith.constant 0.239712775 : f32
    %70 = vector.broadcast %cst_24 : f32 to vector<16x2xf32>
    %71 = arith.subf %56, %70 : vector<16x2xf32>
    %72 = arith.select %69, %67, %71 : vector<16x2xi1>, vector<16x2xf32>
    %c64 = arith.constant 64 : index
    %c0_25 = arith.constant 0 : index
    %73 = vector.load %arg1[%c64, %c0_25] : memref<80x64xbf16, #tpu.memory_space<vmem>>, vector<16x2xbf16>
    %cst_26 = arith.constant 5.000000e-01 : bf16
    %74 = vector.broadcast %cst_26 : bf16 to vector<16x2xbf16>
    %75 = arith.cmpf ogt, %73, %74 : vector<16x2xbf16>
    %76 = arith.select %75, %72, %56 : vector<16x2xi1>, vector<16x2xf32>
    %cst_27 = arith.constant 3.000000e+01 : f32
    %77 = vector.broadcast %cst_27 : f32 to vector<16x2xf32>
    %78 = arith.mulf %76, %77 : vector<16x2xf32>
    %c0_28 = arith.constant 0 : index
    %c0_29 = arith.constant 0 : index
    %79 = vector.load %arg2[%c0_28, %c0_29] : memref<64x2xf32, #tpu.memory_space<vmem>>, vector<16x2xf32>
    tpu.vector_store %arg2[%c0_28, %c0_29], %78 {strides = array<i32>} : memref<64x2xf32, #tpu.memory_space<vmem>>, vector<16x2xf32>,
    %c16_30 = arith.constant 16 : index
    %c0_31 = arith.constant 0 : index
    %80 = vector.load %arg2[%c16_30, %c0_31] : memref<64x2xf32, #tpu.memory_space<vmem>>, vector<16x2xf32>
    tpu.vector_store %arg2[%c16_30, %c0_31], %56 {strides = array<i32>} : memref<64x2xf32, #tpu.memory_space<vmem>>, vector<16x2xf32>,
    %c32 = arith.constant 32 : index
    %c0_32 = arith.constant 0 : index
    %81 = vector.load %arg2[%c32, %c0_32] : memref<64x2xf32, #tpu.memory_space<vmem>>, vector<32x2xf32>
    tpu.vector_store %arg2[%c32, %c0_32], %31 {strides = array<i32>} : memref<64x2xf32, #tpu.memory_space<vmem>>, vector<32x2xf32>,
    return
  }
}

</mosaic_0001>

<bundles_post_ra>
// kernel: base_model_forward.1
= control target key start
LH: loop header
LB: loop body
LE: loop exit
PB: predicated region body
PF: predicated region fallthrough
CT: control target
= control target key end

     0   :  { %vm80_vm0 = vcmask 1041408   ;;  %v539_v1 = vmov 0   ;;  %vm81_vm1 = vcmask 1042432   ;;  %v540_v3 = vmov 65535   ;;  %s662_s0 = inlined_call_operand.vmem [shape: bf16[37,512], index: 0, kind: input, shape index: {}]   ;;  %s663_s1 = inlined_call_operand.vmem [shape: bf16[80,64], index: 1, kind: input, shape index: {}]   ;;  %s664_s2 = inlined_call_operand.vmem [shape: f32[64,2], index: 2, kind: output, shape index: {}]  }
   0x1   :  { %v507_v0 = vld [vmem:[%s662_s0 + $0x4] ss:$16 sps:$4 sm:$0xff]   ;;  %128 = vmatprep.mubr.bf16.mxu0 %v539_v1  ;;  %169 = vmatprep.mubr.bf16.mxu1 %v539_v1  ;;  %v509_v2 = vld [vmem:[%s662_s0] ss:$16 sps:$4 sm:$0xff]   ;;  %v82_v4 = vsel %vm80_vm0, 4294967295, %v540_v3  ;;  %vm76_vm2 = vcmask 302080   ;;  %v182_v52 = vlaneseq }
   0x2   :  { %96 = vmatprep.subr.bf16.mxu0 %v507_v0  ;;  %v510_v5 = vld [vmem:[%s662_s0 + $0xc] ss:$16 sps:$4 sm:$0xff]   ;;  %v512_v6 = vld [vmem:[%s662_s0 + $0x8] ss:$16 sps:$4 sm:$0xff]   ;;  %v513_v7 = vld [vmem:[%s662_s0 + $0x24] ss:$16 sps:$4 sm:$0xff]  }
   0x3   :  { %97 = vmatpush1.bf16.msra.mxu0 %v509_v2  ;;  %v515_v8 = vld [vmem:[%s662_s0 + $0x20] ss:$16 sps:$4 sm:$0xff]   ;;  %137 = vmatprep.subr.bf16.mxu1 %v510_v5  ;;  %v516_v9 = vld [vmem:[%s662_s0 + $0x2c] ss:$16 sps:$4 sm:$0xff]   ;;  %v83_v10 = vsel %vm81_vm1, %v82_v4, 0  ;;  %vm234_vm3 = vcmask 64512  }
   0x4   :  { %138 = vmatpush1.bf16.msra.mxu1 %v512_v6  ;;  %98 = vmatprep.subr.bf16.mxu0 %v513_v7  ;;  %v518_v11 = vld [vmem:[%s662_s0 + $0x28] ss:$16 sps:$4 sm:$0xff]   ;;  %v24_v12 = vld [vmem:[%s662_s0 + $0x40] sm:$0x77]  ;;  %v197_v38 = vld [vmem:[%s663_s1 + $0x10] sm:$0xff]   ;;  %v541_v41 = vmov 8  }
   0x5   :  { %v25_v13 = vld [vmem:[%s662_s0 + $0x48] sm:$0x77]  ;;  %139 = vmatprep.subr.bf16.mxu1 %v516_v9  ;;  %v455_v14 = vcombine.high %v24_v12, %v24_v12  ;;  %v454_v15 = vcombine.low %v24_v12, %v24_v12  ;;  %v15_v22 = vld [vmem:[%s663_s1] sm:$0xf]  ;;  %500 = vset.pattern.permute.xlu1 %v541_v41  ;;  %v202_v42 = vunpack.c.h.bf16 %v197_v38  ;;  %v201_v44 = vunpack.c.l.bf16 %v197_v38  ;;  %v473_v45 = vld [vmem:[%s663_s1 + $0x18] sm:$0xff]  }
   0x6   :  { %v457_v16 = vcombine.high %v25_v13, %v25_v13  ;;  %v456_v17 = vcombine.low %v25_v13, %v25_v13  ;;  %v195_v37 = vld [vmem:[%s663_s1 + $0x8] sm:$0xff]   ;;  %506 = vset.pattern.permute.xlu0 %v541_v41  ;;  %v604_v46 = vunpack.c.l.bf16 %v473_v45  ;;  %v608_v48 = vunpack.c.h.bf16 %v473_v45 }
   0x7   :  { %99 = vmatpush1.bf16.msra.mxu0 %v515_v8  ;;  %v88_v18 = vand.u32 %v455_v14, %v83_v10  ;;  %v85_v19 = vand.u32 %v454_v15, %v83_v10  ;;  %v199_v39 = vunpack.c.l.bf16 %v195_v37  ;;  %v200_v40 = vunpack.c.h.bf16 %v195_v37 }
   0x8   :  { %v94_v20 = vand.u32 %v457_v16, %v83_v10  ;;  %140 = vmatpush1.bf16.msra.mxu1 %v518_v11  ;;  %v91_v21 = vand.u32 %v456_v17, %v83_v10  ;;  %v318_v47 = vmul.f32 %v604_v46, %v604_v46  ;;  %vm320_vm4 = vcmask 261120  }
   0x9   :  { %100 = vmatprep.subr.bf16.mxu0 %v88_v18  ;;  %v501_v43 = vpack.i.bf16 %v200_v40, %v199_v39  ;;  %v319_v50 = vmul.f32 %v608_v48, %v608_v48  ;;  %v183_v53 = vand.u32 127, %v182_v52  ;;  %vm241_vm7 = vcmask 1043456  }
   0xa   :  { %141 = vmatprep.subr.bf16.mxu1 %v94_v20  ;;  %v321_v49 = vsel %vm320_vm4, %v318_v47, 0.0  ;;  %v542_v61 = vmov 0.0   ;;  %vm543_vm8 = vmmov 0   ;;  %vm302_vm9 = vcmask 15360  }
   0xb   :  { %101 = vmatpush1.bf16.msra.mxu0 %v85_v19  ;;  %502 = vperm.xlu1 %500, %v501_v43   ;;  %v324_v51 = vsel %vm320_vm4, %v319_v50, 0.0  ;;  %vm187_vm5 = vcmp.eq.s32.totalorder %v183_v53, 0  ;;  %vm192_vm6 = vcmp.eq.s32.totalorder %v183_v53, 1 }
   0xc   :  { %142 = vmatpush1.bf16.msra.mxu1 %v91_v21 }
   0xd   :  { %486 = vmatprep.subr.bf16.mxu1 %v542_v61 }
   0xe   :  { %458 = vmatmul.mubr.msk.bf16.vlgmr.msra.gmra.mrb[0].mxu0 %vm76_vm2, %v15_v22 }
   0xf   :  { %459 = vmatmul.mubr.msk.bf16.vlgmr.msra.gmra.mrb[0].mxu1 %vm76_vm2, %v15_v22  ;;  %482 = vmatprep.mubr.msk.bf16.mxu0 %vm234_vm3, %v195_v37 }
  0x10   :  { %216 = vperm.xlu1 %500, %v201_v44   ;;  %490 = vmatprep.mubr.msk.bf16.mxu1 %vm543_vm8, %v542_v61 }
  0x34   :  { %322 = vadd.xlane.f32.xlu1 %v321_v49 }
  0x38   :  { %325 = vadd.xlane.f32.xlu1 %v324_v51 }
  0x8a   :  { %v503_v62 = vpop.permute.xlu1 %502 }
  0x8f   :  { %v217_v63 = vpop.permute.xlu1 %216 }
  0xe1   :  { %v130_v23 = vpop.f32.mrb[0].mxu0 }
  0xe2   :  { %v178_v24 = vmax.f32 %v130_v23, 0.0  ;;  %v132_v25 = vpop.f32.mrb[1].mxu0  ;;  %v171_v27 = vpop.f32.mrb[0].mxu1 }
  0xe3   :  { %v179_v26 = vmax.f32 %v132_v25, 0.0  ;;  %v134_v28 = vpop.f32.mrb[2].mxu0  ;;  %v180_v29 = vmax.f32 %v171_v27, 0.0  ;;  %v173_v30 = vpop.f32.mrb[1].mxu1 }
  0xe4   :  { %v135_v31 = vpop.f32.mrb[3].mxu0  ;;  %v181_v32 = vmax.f32 %v173_v30, 0.0  ;;  %v175_v33 = vpop.f32.mrb[2].mxu1 }
  0xe5   :  { %v184_v34 = vadd.f32 %v179_v26, %v178_v24  ;;  %v176_v35 = vpop.f32.mrb[3].mxu1  ;;  %v323_v24 = vpop.xlane.xlu1 %322 }
  0xe6   :  { %v189_v36 = vadd.f32 %v181_v32, %v180_v29  ;;  %v327_v30 = vadd.f32 1e-12, %v323_v24 }
  0xe7   :  { %185 = vadd.xlane.f32.xlu0 %v184_v34 }
  0xe9   :  { %v326_v28 = vpop.xlane.xlu1 %325 }
  0xea   :  { %v328_v31 = vadd.f32 1e-12, %v326_v28 }
  0xeb   :  { %190 = vadd.xlane.f32.xlu0 %v189_v36 }
 0x101   :  { %221 = vperm.xlu0 %506, %v202_v42  }
 0x174   :  { %v186_v54 = vpop.xlane.xlu0 %185 }
 0x175   :  { %v188_v55 = vsel %vm187_vm5, %v186_v54, 0.0 }
 0x178   :  { %v191_v56 = vpop.xlane.xlu0 %190 }
 0x179   :  { %v193_v57 = vsel %vm192_vm6, %v191_v56, %v188_v55  ;;  %v420_v56 = vld [vmem:[%s663_s1 + $0x20] sm:$0xf] }
 0x17a   :  { %v194_v58 = vmul.f32 0.00390625, %v193_v57  ;;  %v421_v57 = vld [vmem:[%s663_s1 + $0x24] sm:$0xf]  ;;  %vm422_vm10 = vcmp.gt.bf16.partialorder %v420_v56, 1056980736 }
 0x17b   :  { %vm423_vm11 = vcmp.gt.bf16.partialorder %v421_v57, 1056980736 }
 0x17c   :  { %v203_v59 = vpack.c.bf16 %v194_v58, %v194_v58 }
 0x17e   :  { %494 = vmatprep.subr.msk.bf16.mxu0 %vm241_vm7, %v203_v59  ;;  %v243_v60 = vsel %vm241_vm7, %v203_v59, 0  ;;  %v424_v59 = vsel %vm422_vm10, 65537, %v539_v1 }
 0x17f   :  { %481 = vmatpush3.bf16.msra.mxu0 %v243_v60 }
 0x180   :  { %v222_v2 = vpop.permute.xlu0 %221 }
 0x182   :  { %483 = vmatmul.mubr.msk.bf16.vlgmr.msra.gmra.mrb[4].mxu0 %vm234_vm3, %v197_v38 }
 0x255   :  { %v484_v0 = vpop.f32.mrb[4].mxu0 }
 0x256   :  { %v288_v3 = vadd.f32 %v484_v0, %v217_v63  ;;  %v279_v4 = vpop.f32.mrb[5].mxu0  ;;  %v425_v63 = vsel %vm423_vm11, 65537, %v539_v1  ;;  %v426_v0 = vunpack.c.l.b16 %v424_v59 }
 0x257   :  { %v537_v5 = vadd.low.f32.bf16 %v279_v4, %v503_v62  ;;  %v485_v6 = vpop.f32.mrb[6].mxu0 }
 0x258   :  { %440 = vst.msk [vmem:[%s664_s2 + $0x30] sm:$0xff] %vm302_vm9, %v288_v3  ;;  %v282_v7 = vpop.f32.mrb[7].mxu0  ;;  %v291_v8 = vadd.f32 %v485_v6, %v222_v2  ;;  %v300_v11 = vmul.f32 %v288_v3, %v288_v3  ;;  %vm428_vm0 = vcmp.ne.s32.totalorder %v426_v0, 0 }
 0x259   :  { %v298_v9 = vmul.f32 %v537_v5, %v537_v5  ;;  %438 = vst.msk [vmem:[%s664_s2 + $0x20] sm:$0xff] %vm302_vm9, %v537_v5  ;;  %v538_v10 = vadd.high.f32.bf16 %v282_v7, %v503_v62 }
 0x25a   :  { %441 = vst.msk [vmem:[%s664_s2 + $0x38] sm:$0xff] %vm302_vm9, %v291_v8  ;;  %v301_v15 = vmul.f32 %v291_v8, %v291_v8  ;;  %v306_v17 = vsel %vm302_vm9, %v300_v11, 0.0 }
 0x25b   :  { %v299_v12 = vmul.f32 %v538_v10, %v538_v10  ;;  %439 = vst.msk [vmem:[%s664_s2 + $0x28] sm:$0xff] %vm302_vm9, %v538_v10  ;;  %v303_v13 = vsel %vm302_vm9, %v298_v9, 0.0 }
 0x25c   :  { %v308_v19 = vsel %vm302_vm9, %v301_v15, 0.0 }
 0x25d   :  { %v304_v14 = vsel %vm302_vm9, %v299_v12, 0.0 }
 0x25e   :  { %v305_v16 = vadd.f32 %v304_v14, %v303_v13 }
 0x260   :  { %v307_v18 = vadd.f32 %v306_v17, %v305_v16 }
 0x262   :  { %v309_v20 = vadd.f32 %v308_v19, %v307_v18 }
 0x264   :  { %v310_v21 = vrot.slane %v309_v20, 4 }
 0x266   :  { %v311_v22 = vadd.f32 %v310_v21, %v309_v20 }
 0x268   :  { %v312_v23 = vrot.slane %v311_v22, 2 }
 0x26a   :  { %v313_v25 = vadd.f32 %v312_v23, %v311_v22 }
 0x26c   :  { %v314_v26 = vrot.slane %v313_v25, 1 }
 0x26e   :  { %v315_v27 = vadd.f32 %v314_v26, %v313_v25 }
 0x270   :  { %v316_v29 = vadd.f32 1e-12, %v315_v27 }
 0x272   :  { %527 = vrsqrt.f32 %v316_v29 }
 0x273   :  { %529 = vrsqrt.f32 %v327_v30 }
 0x274   :  { %531 = vrsqrt.f32 %v328_v31 }
 0x27c   :  { %v528_v32 = vpop.eup %527 }
 0x27d   :  { %v333_v33 = vmul.f32 %v528_v32, %v288_v3  ;;  %v334_v34 = vmul.f32 %v528_v32, %v291_v8  ;;  %v331_v35 = vmul.f32 %v537_v5, %v528_v32  ;;  %v332_v36 = vmul.f32 %v538_v10, %v528_v32  ;;  %v530_v37 = vpop.eup %529 }
 0x27e   :  { %v532_v38 = vpop.eup %531  ;;  %v337_v41 = vmul.f32 %v530_v37, %v604_v46  ;;  %v427_v8 = vunpack.c.l.b16 %v425_v63 }
 0x27f   :  { %v336_v39 = vpack.c.bf16 %v334_v34, %v333_v33  ;;  %v335_v40 = vpack.c.bf16 %v332_v36, %v331_v35  ;;  %v338_v42 = vmul.f32 %v532_v38, %v608_v48 }
 0x280   :  { %vm429_vm2 = vcmp.ne.s32.totalorder %v427_v8, 0 }
 0x281   :  { %487 = vmatpush3.bf16.msra.mxu1 %v335_v40  ;;  %v339_v43 = vpack.c.bf16 %v338_v42, %v337_v41 }
 0x282   :  { %488 = vmatprep.subr.bf16.mxu1 %v542_v61 }
 0x285   :  { %489 = vmatpush3.bf16.msra.mxu1 %v336_v39 }
 0x288   :  { %491 = vmatmul.mubr.msk.bf16.vlgmr.msra.gmra.mrb[4].mxu1 %vm320_vm4, %v339_v43 }
 0x35b   :  { %v377_v44 = vpop.f32.mrb[4].mxu1 }
 0x35c   :  { %v465_v45 = vclamps-f32 %v377_v44, 1.0  ;;  %v492_v47 = vpop.f32.mrb[5].mxu1 }
 0x35d   :  { %v380_v49 = vpop.f32.mrb[6].mxu1 }
 0x35e   :  { %v388_v50 = vmul.f32 %v465_v45, %v465_v45  ;;  %436 = vst.msk [vmem:[%s664_s2 + $0x10] sm:$0xff] %vm302_vm9, %v465_v45  ;;  %v466_v51 = vclamps-f32 %v380_v49, 1.0  ;;  %v493_v52 = vpop.f32.mrb[7].mxu1  ;;  %v408_v5 = vmul.f32 0.87758255, %v465_v45 }
 0x35f   :  { %v467_v11 = vadd.f32 -0.23971277, %v465_v45  ;;  %vm414_vm1 = vcmp.gt.f32.partialorder %v465_v45, -0.87758255 }
 0x360   :  { %v390_v46 = vsub.f32 1.0, %v388_v50  ;;  %v389_v53 = vmul.f32 %v466_v51, %v466_v51  ;;  %437 = vst.msk [vmem:[%s664_s2 + $0x18] sm:$0xff] %vm302_vm9, %v466_v51  ;;  %v409_v13 = vmul.f32 0.87758255, %v466_v51  ;;  %v468_v17 = vadd.f32 -0.23971277, %v466_v51 }
 0x361   :  { %vm415_vm3 = vcmp.gt.f32.partialorder %v466_v51, -0.87758255 }
 0x362   :  { %v392_v48 = vmax.f32 %v390_v46, 0.0  ;;  %v391_v54 = vsub.f32 1.0, %v389_v53 }
 0x364   :  { %533 = vrsqrt.f32 %v392_v48  ;;  %v393_v55 = vmax.f32 %v391_v54, 0.0  ;;  %vm396_vm12 = vcmp.eq.f32.partialorder %v392_v48, inf  ;;  %v399_v61 = vand.u32 2147483648, %v392_v48 }
 0x365   :  { %vm398_vm13 = vcmp.eq.f32.partialorder %v392_v48, 0.0 }
 0x366   :  { %535 = vrsqrt.f32 %v393_v55  ;;  %vm403_vm14 = vcmp.eq.f32.partialorder %v393_v55, inf  ;;  %v406_v7 = vand.u32 2147483648, %v393_v55  ;;  %vm405_vm15 = vcmp.eq.f32.partialorder %v393_v55, 0.0 }
 0x36e   :  { %v534_v58 = vpop.eup %533 }
 0x36f   :  { %v395_v60 = vmul.f32 %v534_v58, %v392_v48 }
 0x370   :  { %v536_v62 = vpop.eup %535 }
 0x371   :  { %v397_v2 = vsel %vm396_vm12, %v392_v48, %v395_v60  ;;  %v402_v4 = vmul.f32 %v536_v62, %v393_v55 }
 0x372   :  { %v400_v3 = vsel %vm398_vm13, %v399_v61, %v397_v2 }
 0x373   :  { %v410_v6 = vmul.f32 0.47942555, %v400_v3  ;;  %v404_v9 = vsel %vm403_vm14, %v393_v55, %v402_v4 }
 0x374   :  { %v407_v12 = vsel %vm405_vm15, %v406_v7, %v404_v9 }
 0x375   :  { %v412_v10 = vsub.f32 %v408_v5, %v410_v6  ;;  %v411_v14 = vmul.f32 0.47942555, %v407_v12 }
 0x377   :  { %v418_v1 = vsel %vm414_vm1, %v412_v10, %v467_v11  ;;  %v413_v16 = vsub.f32 %v409_v13, %v411_v14 }
 0x378   :  { %v430_v15 = vsel %vm428_vm0, %v418_v1, %v465_v45 }
 0x379   :  { %v432_v18 = vmul.f32 30.0, %v430_v15  ;;  %v419_v19 = vsel %vm415_vm3, %v413_v16, %v468_v17 }
 0x37a   :  { %v431_v20 = vsel %vm429_vm2, %v419_v19, %v466_v51 }
 0x37b   :  { %434 = vst.msk [vmem:[%s664_s2] sm:$0xff] %vm302_vm9, %v432_v18  ;;  %v433_v21 = vmul.f32 30.0, %v431_v20 }
 0x37d   :  { %435 = vst.msk [vmem:[%s664_s2 + $0x8] sm:$0xff] %vm302_vm9, %v433_v21 }

</bundles_post_ra>
